<compile_context>
chip_gen: v7x
topology: tpu7x:2x2x1
jax: 0.10.0
libtpu: 0.0.40
codegen_flags: <defaults>
</compile_context>

<pallas_src>
import functools

import jax
import jax.numpy as jnp
from jax.experimental import pallas as pl
from jax.experimental.pallas import tpu as pltpu

# smp defaults for TverskyLoss(mode='multilabel', log_loss=False)
ALPHA = 0.5
BETA = 0.5
SMOOTH = 0.0
EPS = 1e-7
W1 = 0.5   # weight on BCE
W2 = 0.5   # weight on Tversky

PAD_LOGIT = -100.0   # sigmoid(-100) == 0.0f, log(1+exp(-100)) == 0.0f -> pad terms vanish


def _round_up(x, m):
    return (x + m - 1) // m * m


def _partial_sums_kernel(yp_ref, yt_ref,
                         bce_ref, inter_ref, psum_ref, tsum_ref,
                         *, approx_recip):
    """Accumulate per-(b, class) partial sums over the j (spatial-chunk) axis."""
    j = pl.program_id(1)

    @pl.when(j == 0)
    def _init():
        bce_ref[...] = jnp.zeros_like(bce_ref)
        inter_ref[...] = jnp.zeros_like(inter_ref)
        psum_ref[...] = jnp.zeros_like(psum_ref)
        tsum_ref[...] = jnp.zeros_like(tsum_ref)

    x = yp_ref[...].astype(jnp.float32)   # logits,  block (1, C, g_block, 8, 128)
    t = yt_ref[...].astype(jnp.float32)   # targets, block (1, C, g_block, 8, 128)

    # One exp(-|x|) feeds both the stable BCE term and the sigmoid.
    e = jnp.exp(-jnp.abs(x))              # in (0, 1]
    # log(1+e) instead of log1p(e): abs error <= e (< 4e-8) only when 1+e
    # rounds to 1 -> negligible, and it skips log1p's compare/select/divide.
    log1pe = jnp.log(1.0 + e)
    if approx_recip:
        # EUP vrcp, ~2^-12 relative error; only feeds the Tversky sums.
        s = pl.reciprocal(1.0 + e, approx=True)
    else:
        s = 1.0 / (1.0 + e)
    p = jnp.where(x >= 0.0, s, 1.0 - s)   # sigmoid(x)

    # Numerically-stable BCE-with-logits: max(x,0) - x*t + log(1 + exp(-|x|))
    bce = jnp.maximum(x, 0.0) - x * t + log1pe
    inter = p * t

    # Reduce only over the g (vreg-chunk) axis: pure element-wise vreg adds
    # into the resident lane/sublane-dense (1, C, 8, 128) output blocks.
    bce_ref[...] += jnp.sum(bce, axis=2)
    inter_ref[...] += jnp.sum(inter, axis=2)
    psum_ref[...] += jnp.sum(p, axis=2)
    tsum_ref[...] += jnp.sum(t, axis=2)


def _default_block_bytes():
    """Per-generation input-block target (bytes per input block)."""
    try:
        kind = jax.devices()[0].device_kind.lower()
    except Exception:
        return 4 << 20
    if "v5 lite" in kind or "v5e" in kind or "v5lite" in kind:
        return 2 << 20     # v5e: memory-bound, small default scoped VMEM
    if "v6" in kind:
        return 6 << 20     # v6e: 128 MiB VMEM, amortize per-step overhead
    return 4 << 20         # v7x (64 MiB VMEM) and others


def bce_and_tversky(y_pred, y_true, *, target_block_bytes=None, approx_recip=False):
    """y_pred: NCHW logits; y_true: NCHW (soft) targets. Returns scalar loss."""
    assert y_pred.shape == y_true.shape
    B, C, H, W = y_pred.shape
    hw = H * W
    itemsize = jnp.dtype(y_pred.dtype).itemsize
    if target_block_bytes is None:
        target_block_bytes = _default_block_bytes()

    # Free reshape: HW is already the contiguous minor axis; keep caller dtype.
    yp = y_pred.reshape(B, C, hw)
    yt = y_true.reshape(B, C, hw)

    hw_pad = _round_up(hw, 8 * 128)
    if hw_pad != hw:
        # Only triggers when H*W is not a multiple of 1024 (rare for real
        # segmentation shapes).  Padded logits/targets contribute exactly 0.
        # TODO(synk): for large ragged H*W, replace this pad (an extra HBM
        # read+write pass) with in-kernel tail masking via scalar prefetch.
        yp = jnp.pad(yp, ((0, 0), (0, 0), (0, hw_pad - hw)), constant_values=PAD_LOGIT)
        yt = jnp.pad(yt, ((0, 0), (0, 0), (0, hw_pad - hw)), constant_values=0.0)

    G = hw_pad // (8 * 128)
    yp = yp.reshape(B, C, G, 8, 128)      # free view: lane/sublane-dense blocks
    yt = yt.reshape(B, C, G, 8, 128)

    # --- block sizing under a conservative VMEM budget -----------------------
    per_g_in = C * 8 * 128 * itemsize                  # one g-slab of one input
    per_g_f32 = C * 8 * 128 * 4
    # 2 inputs x 2 pipeline buffers + ~4 block-sized f32 cast/temporary slabs.
    per_g_vmem = 4 * per_g_in + 4 * per_g_f32
    vmem_budget = 56 << 20                             # safe under v7x's 64 MiB
    g_budget = max(1, vmem_budget // per_g_vmem)
    g_target = int(min(G, g_budget, max(1, target_block_bytes // per_g_in)))
    # Largest divisor of G <= g_target -> exact grid, no tail masking needed.
    g_block = 1
    for d in range(g_target, 0, -1):
        if G % d == 0:
            g_block = d
            break
    # TODO(synk): for very large C (per_g_vmem > budget) add a class grid axis.

    grid = (B, G // g_block)

    out_bytes = 4 * C * 8 * 128 * 4
    vmem_limit = int(min(64 << 20,
                         max(32 << 20, g_block * per_g_vmem + 2 * out_bytes + (2 << 20))))

    part_shape = jax.ShapeDtypeStruct((B, C, 8, 128), jnp.float32)
    part_spec = pl.BlockSpec((1, C, 8, 128), lambda b, j: (b, 0, 0, 0))
    in_spec = pl.BlockSpec((1, C, g_block, 8, 128), lambda b, j: (b, 0, j, 0, 0))

    n_pad_elems = B * C * hw_pad
    cost = pl.CostEstimate(
        flops=int(12 * n_pad_elems),
        transcendentals=int(2 * n_pad_elems),          # exp + log per element
        bytes_accessed=int(2 * n_pad_elems * itemsize + B * out_bytes),
    )

    kernel = functools.partial(_partial_sums_kernel, approx_recip=approx_recip)

    bce_p, inter_p, psum_p, tsum_p = pl.pallas_call(
        kernel,
        out_shape=(part_shape, part_shape, part_shape, part_shape),
        grid_spec=pltpu.PrefetchScalarGridSpec(
            num_scalar_prefetch=0,
            grid=grid,
            in_specs=[in_spec, in_spec],
            out_specs=[part_spec, part_spec, part_spec, part_spec],
        ),
        compiler_params=pltpu.CompilerParams(
            dimension_semantics=("parallel", "arbitrary"),
            vmem_limit_bytes=vmem_limit),
        cost_estimate=cost,
    )(yp, yt)

    # --- tiny finalize in plain JAX (few KB of work) --------------------------
    total_elems = float(B * C * H * W)
    bce_mean = jnp.sum(bce_p) / total_elems            # padded terms are 0

    inter_c = jnp.sum(inter_p, axis=(0, 2, 3))         # (C,)
    p_c = jnp.sum(psum_p, axis=(0, 2, 3))
    t_c = jnp.sum(tsum_p, axis=(0, 2, 3))
    fp_c = p_c - inter_c                                # sum(p*(1-t))
    fn_c = t_c - inter_c                                # sum((1-p)*t)
    denom = inter_c + ALPHA * fp_c + BETA * fn_c + SMOOTH
    tversky = (inter_c + SMOOTH) / jnp.maximum(denom, EPS)
    mask = (t_c > 0.0).astype(jnp.float32)              # skip empty classes
    tversky_loss = jnp.sum((1.0 - tversky) * mask) / C

    return W1 * bce_mean + W2 * tversky_loss


def _reference(y_pred, y_true):
    # Pure-JAX replica of 0.5*SoftBCEWithLogitsLoss + 0.5*TverskyLoss('multilabel')
    B, C, H, W = y_pred.shape
    bce = jnp.mean(jnp.maximum(y_pred, 0.0) - y_pred * y_true
                   + jnp.log1p(jnp.exp(-jnp.abs(y_pred))))
    p = jax.nn.sigmoid(y_pred).reshape(B, C, -1)
    t = y_true.reshape(B, C, -1)
    inter = jnp.sum(p * t, axis=(0, 2))
    fp = jnp.sum(p * (1.0 - t), axis=(0, 2))
    fn = jnp.sum((1.0 - p) * t, axis=(0, 2))
    tv = (inter + SMOOTH) / jnp.maximum(inter + ALPHA * fp + BETA * fn + SMOOTH, EPS)
    mask = (jnp.sum(t, axis=(0, 2)) > 0).astype(jnp.float32)
    tvl = jnp.mean((1.0 - tv) * mask)
    return W1 * bce + W2 * tvl


if __name__ == "__main__":
    key = jax.random.PRNGKey(0)
    k1, k2 = jax.random.split(key)
    B, C, H, W = 2, 4, 16, 16
    y_pred = jax.random.normal(k1, (B, C, H, W), dtype=jnp.float32)      # logits
    y_true = (jax.random.uniform(k2, (B, C, H, W)) > 0.5).astype(jnp.float32)

    loss = bce_and_tversky(y_pred, y_true)
    loss = jax.block_until_ready(loss)

    ref = _reference(y_pred, y_true)
    assert jnp.allclose(loss, ref, atol=1e-5, rtol=1e-5), (loss, ref)
    print("KERNEL_OK")
</pallas_src>

<mosaic_0001>
module attributes {stable_mosaic.version = 11 : i64} {
  func.func @_partial_sums_kernel(%arg0: i32, %arg1: i32, %arg2: memref<1x4x1x8x128xf32, #tpu.memory_space<vmem>>, %arg3: memref<1x4x1x8x128xf32, #tpu.memory_space<vmem>>, %arg4: memref<1x4x8x128xf32, #tpu.memory_space<vmem>>, %arg5: memref<1x4x8x128xf32, #tpu.memory_space<vmem>>, %arg6: memref<1x4x8x128xf32, #tpu.memory_space<vmem>>, %arg7: memref<1x4x8x128xf32, #tpu.memory_space<vmem>>) attributes {dimension_semantics = [#tpu.dimension_semantics<parallel>, #tpu.dimension_semantics<arbitrary>], iteration_bounds = array<i64: 2, 1>, scalar_prefetch = 0 : i64, scratch_operands = 0 : i64, tpu.core_type = #tpu.core_type<tc>, window_params = [{transform_indices = @transform_0, window_bounds = array<i64: 1, 4, 1, 8, 128>}, {transform_indices = @transform_1, window_bounds = array<i64: 1, 4, 1, 8, 128>}, {transform_indices = @transform_2, window_bounds = array<i64: 1, 4, 8, 128>}, {transform_indices = @transform_3, window_bounds = array<i64: 1, 4, 8, 128>}, {transform_indices = @transform_4, window_bounds = array<i64: 1, 4, 8, 128>}, {transform_indices = @transform_5, window_bounds = array<i64: 1, 4, 8, 128>}]} {
    %c0_i32 = arith.constant 0 : i32
    %0 = arith.cmpi eq, %arg1, %c0_i32 : i32
    %1 = arith.extui %0 : i1 to i32
    %c0_i32_0 = arith.constant 0 : i32
    %2 = arith.cmpi ne, %1, %c0_i32_0 : i32
    scf.if %2 {
      %cst_52 = arith.constant 0.000000e+00 : f32
      %43 = vector.broadcast %cst_52 : f32 to vector<1x4x8x128xf32>
      %c0_53 = arith.constant 0 : index
      %c0_54 = arith.constant 0 : index
      %c0_55 = arith.constant 0 : index
      %c0_56 = arith.constant 0 : index
      %44 = vector.load %arg4[%c0_53, %c0_54, %c0_55, %c0_56] : memref<1x4x8x128xf32, #tpu.memory_space<vmem>>, vector<1x4x8x128xf32>
      tpu.vector_store %arg4[%c0_53, %c0_54, %c0_55, %c0_56], %43 {strides = array<i32>} : memref<1x4x8x128xf32, #tpu.memory_space<vmem>>, vector<1x4x8x128xf32>,
      %cst_57 = arith.constant 0.000000e+00 : f32
      %45 = vector.broadcast %cst_57 : f32 to vector<1x4x8x128xf32>
      %c0_58 = arith.constant 0 : index
      %c0_59 = arith.constant 0 : index
      %c0_60 = arith.constant 0 : index
      %c0_61 = arith.constant 0 : index
      %46 = vector.load %arg5[%c0_58, %c0_59, %c0_60, %c0_61] : memref<1x4x8x128xf32, #tpu.memory_space<vmem>>, vector<1x4x8x128xf32>
      tpu.vector_store %arg5[%c0_58, %c0_59, %c0_60, %c0_61], %45 {strides = array<i32>} : memref<1x4x8x128xf32, #tpu.memory_space<vmem>>, vector<1x4x8x128xf32>,
      %cst_62 = arith.constant 0.000000e+00 : f32
      %47 = vector.broadcast %cst_62 : f32 to vector<1x4x8x128xf32>
      %c0_63 = arith.constant 0 : index
      %c0_64 = arith.constant 0 : index
      %c0_65 = arith.constant 0 : index
      %c0_66 = arith.constant 0 : index
      %48 = vector.load %arg6[%c0_63, %c0_64, %c0_65, %c0_66] : memref<1x4x8x128xf32, #tpu.memory_space<vmem>>, vector<1x4x8x128xf32>
      tpu.vector_store %arg6[%c0_63, %c0_64, %c0_65, %c0_66], %47 {strides = array<i32>} : memref<1x4x8x128xf32, #tpu.memory_space<vmem>>, vector<1x4x8x128xf32>,
      %cst_67 = arith.constant 0.000000e+00 : f32
      %49 = vector.broadcast %cst_67 : f32 to vector<1x4x8x128xf32>
      %c0_68 = arith.constant 0 : index
      %c0_69 = arith.constant 0 : index
      %c0_70 = arith.constant 0 : index
      %c0_71 = arith.constant 0 : index
      %50 = vector.load %arg7[%c0_68, %c0_69, %c0_70, %c0_71] : memref<1x4x8x128xf32, #tpu.memory_space<vmem>>, vector<1x4x8x128xf32>
      tpu.vector_store %arg7[%c0_68, %c0_69, %c0_70, %c0_71], %49 {strides = array<i32>} : memref<1x4x8x128xf32, #tpu.memory_space<vmem>>, vector<1x4x8x128xf32>,
    } else {
    }
    %c0 = arith.constant 0 : index
    %c0_1 = arith.constant 0 : index
    %c0_2 = arith.constant 0 : index
    %c0_3 = arith.constant 0 : index
    %c0_4 = arith.constant 0 : index
    %3 = vector.load %arg2[%c0, %c0_1, %c0_2, %c0_3, %c0_4] : memref<1x4x1x8x128xf32, #tpu.memory_space<vmem>>, vector<1x4x1x8x128xf32>
    %c0_5 = arith.constant 0 : index
    %c0_6 = arith.constant 0 : index
    %c0_7 = arith.constant 0 : index
    %c0_8 = arith.constant 0 : index
    %c0_9 = arith.constant 0 : index
    %4 = vector.load %arg3[%c0_5, %c0_6, %c0_7, %c0_8, %c0_9] : memref<1x4x1x8x128xf32, #tpu.memory_space<vmem>>, vector<1x4x1x8x128xf32>
    %5 = math.absf %3 : vector<1x4x1x8x128xf32>
    %cst = arith.constant 0.000000e+00 : f32
    %6 = vector.broadcast %cst : f32 to vector<1x4x1x8x128xf32>
    %7 = arith.subf %6, %5 : vector<1x4x1x8x128xf32>
    %8 = math.exp %7 : vector<1x4x1x8x128xf32>
    %cst_10 = arith.constant 1.000000e+00 : f32
    %9 = vector.broadcast %cst_10 : f32 to vector<1x4x1x8x128xf32>
    %10 = arith.addf %9, %8 : vector<1x4x1x8x128xf32>
    %11 = math.log %10 : vector<1x4x1x8x128xf32>
    %cst_11 = arith.constant 1.000000e+00 : f32
    %12 = vector.broadcast %cst_11 : f32 to vector<1x4x1x8x128xf32>
    %13 = arith.addf %12, %8 : vector<1x4x1x8x128xf32>
    %cst_12 = arith.constant 1.000000e+00 : f32
    %14 = vector.broadcast %cst_12 : f32 to vector<1x4x1x8x128xf32>
    %15 = arith.divf %14, %13 : vector<1x4x1x8x128xf32>
    %cst_13 = arith.constant 0.000000e+00 : f32
    %16 = vector.broadcast %cst_13 : f32 to vector<1x4x1x8x128xf32>
    %17 = arith.cmpf oge, %3, %16 : vector<1x4x1x8x128xf32>
    %cst_14 = arith.constant 1.000000e+00 : f32
    %18 = vector.broadcast %cst_14 : f32 to vector<1x4x1x8x128xf32>
    %19 = arith.subf %18, %15 : vector<1x4x1x8x128xf32>
    %20 = arith.select %17, %15, %19 : vector<1x4x1x8x128xi1>, vector<1x4x1x8x128xf32>
    %cst_15 = arith.constant 0.000000e+00 : f32
    %21 = vector.broadcast %cst_15 : f32 to vector<1x4x1x8x128xf32>
    %22 = arith.maximumf %3, %21 : vector<1x4x1x8x128xf32>
    %23 = arith.mulf %3, %4 : vector<1x4x1x8x128xf32>
    %24 = arith.subf %22, %23 : vector<1x4x1x8x128xf32>
    %25 = arith.addf %24, %11 : vector<1x4x1x8x128xf32>
    %26 = arith.mulf %20, %4 : vector<1x4x1x8x128xf32>
    %c0_16 = arith.constant 0 : index
    %c0_17 = arith.constant 0 : index
    %c0_18 = arith.constant 0 : index
    %c0_19 = arith.constant 0 : index
    %27 = vector.load %arg4[%c0_16, %c0_17, %c0_18, %c0_19] : memref<1x4x8x128xf32, #tpu.memory_space<vmem>>, vector<1x4x8x128xf32>
    %cst_20 = arith.constant dense<0.000000e+00> : vector<1x4x8x128xf32>
    %28 = vector.multi_reduction <add>, %25, %cst_20 [2] : vector<1x4x1x8x128xf32> to vector<1x4x8x128xf32>
    %29 = arith.addf %27, %28 : vector<1x4x8x128xf32>
    %c0_21 = arith.constant 0 : index
    %c0_22 = arith.constant 0 : index
    %c0_23 = arith.constant 0 : index
    %c0_24 = arith.constant 0 : index
    %30 = vector.load %arg4[%c0_21, %c0_22, %c0_23, %c0_24] : memref<1x4x8x128xf32, #tpu.memory_space<vmem>>, vector<1x4x8x128xf32>
    tpu.vector_store %arg4[%c0_21, %c0_22, %c0_23, %c0_24], %29 {strides = array<i32>} : memref<1x4x8x128xf32, #tpu.memory_space<vmem>>, vector<1x4x8x128xf32>,
    %c0_25 = arith.constant 0 : index
    %c0_26 = arith.constant 0 : index
    %c0_27 = arith.constant 0 : index
    %c0_28 = arith.constant 0 : index
    %31 = vector.load %arg5[%c0_25, %c0_26, %c0_27, %c0_28] : memref<1x4x8x128xf32, #tpu.memory_space<vmem>>, vector<1x4x8x128xf32>
    %cst_29 = arith.constant dense<0.000000e+00> : vector<1x4x8x128xf32>
    %32 = vector.multi_reduction <add>, %26, %cst_29 [2] : vector<1x4x1x8x128xf32> to vector<1x4x8x128xf32>
    %33 = arith.addf %31, %32 : vector<1x4x8x128xf32>
    %c0_30 = arith.constant 0 : index
    %c0_31 = arith.constant 0 : index
    %c0_32 = arith.constant 0 : index
    %c0_33 = arith.constant 0 : index
    %34 = vector.load %arg5[%c0_30, %c0_31, %c0_32, %c0_33] : memref<1x4x8x128xf32, #tpu.memory_space<vmem>>, vector<1x4x8x128xf32>
    tpu.vector_store %arg5[%c0_30, %c0_31, %c0_32, %c0_33], %33 {strides = array<i32>} : memref<1x4x8x128xf32, #tpu.memory_space<vmem>>, vector<1x4x8x128xf32>,
    %c0_34 = arith.constant 0 : index
    %c0_35 = arith.constant 0 : index
    %c0_36 = arith.constant 0 : index
    %c0_37 = arith.constant 0 : index
    %35 = vector.load %arg6[%c0_34, %c0_35, %c0_36, %c0_37] : memref<1x4x8x128xf32, #tpu.memory_space<vmem>>, vector<1x4x8x128xf32>
    %cst_38 = arith.constant dense<0.000000e+00> : vector<1x4x8x128xf32>
    %36 = vector.multi_reduction <add>, %20, %cst_38 [2] : vector<1x4x1x8x128xf32> to vector<1x4x8x128xf32>
    %37 = arith.addf %35, %36 : vector<1x4x8x128xf32>
    %c0_39 = arith.constant 0 : index
    %c0_40 = arith.constant 0 : index
    %c0_41 = arith.constant 0 : index
    %c0_42 = arith.constant 0 : index
    %38 = vector.load %arg6[%c0_39, %c0_40, %c0_41, %c0_42] : memref<1x4x8x128xf32, #tpu.memory_space<vmem>>, vector<1x4x8x128xf32>
    tpu.vector_store %arg6[%c0_39, %c0_40, %c0_41, %c0_42], %37 {strides = array<i32>} : memref<1x4x8x128xf32, #tpu.memory_space<vmem>>, vector<1x4x8x128xf32>,
    %c0_43 = arith.constant 0 : index
    %c0_44 = arith.constant 0 : index
    %c0_45 = arith.constant 0 : index
    %c0_46 = arith.constant 0 : index
    %39 = vector.load %arg7[%c0_43, %c0_44, %c0_45, %c0_46] : memref<1x4x8x128xf32, #tpu.memory_space<vmem>>, vector<1x4x8x128xf32>
    %cst_47 = arith.constant dense<0.000000e+00> : vector<1x4x8x128xf32>
    %40 = vector.multi_reduction <add>, %4, %cst_47 [2] : vector<1x4x1x8x128xf32> to vector<1x4x8x128xf32>
    %41 = arith.addf %39, %40 : vector<1x4x8x128xf32>
    %c0_48 = arith.constant 0 : index
    %c0_49 = arith.constant 0 : index
    %c0_50 = arith.constant 0 : index
    %c0_51 = arith.constant 0 : index
    %42 = vector.load %arg7[%c0_48, %c0_49, %c0_50, %c0_51] : memref<1x4x8x128xf32, #tpu.memory_space<vmem>>, vector<1x4x8x128xf32>
    tpu.vector_store %arg7[%c0_48, %c0_49, %c0_50, %c0_51], %41 {strides = array<i32>} : memref<1x4x8x128xf32, #tpu.memory_space<vmem>>, vector<1x4x8x128xf32>,
    return
  }
  func.func @transform_0(%arg0: i32, %arg1: i32) -> (i32, i32, i32, i32, i32) {
    %c0_i32 = arith.constant 0 : i32
    %c0_i32_0 = arith.constant 0 : i32
    %c0_i32_1 = arith.constant 0 : i32
    %c0_i32_2 = arith.constant 0 : i32
    return %arg0, %c0_i32, %arg1, %c0_i32_0, %c0_i32_1 : i32, i32, i32, i32, i32
  }
  func.func @transform_1(%arg0: i32, %arg1: i32) -> (i32, i32, i32, i32, i32) {
    %c0_i32 = arith.constant 0 : i32
    %c0_i32_0 = arith.constant 0 : i32
    %c0_i32_1 = arith.constant 0 : i32
    %c0_i32_2 = arith.constant 0 : i32
    return %arg0, %c0_i32, %arg1, %c0_i32_0, %c0_i32_1 : i32, i32, i32, i32, i32
  }
  func.func @transform_2(%arg0: i32, %arg1: i32) -> (i32, i32, i32, i32) {
    %c0_i32 = arith.constant 0 : i32
    %c0_i32_0 = arith.constant 0 : i32
    %c0_i32_1 = arith.constant 0 : i32
    %c0_i32_2 = arith.constant 0 : i32
    return %arg0, %c0_i32, %c0_i32_0, %c0_i32_1 : i32, i32, i32, i32
  }
  func.func @transform_3(%arg0: i32, %arg1: i32) -> (i32, i32, i32, i32) {
    %c0_i32 = arith.constant 0 : i32
    %c0_i32_0 = arith.constant 0 : i32
    %c0_i32_1 = arith.constant 0 : i32
    %c0_i32_2 = arith.constant 0 : i32
    return %arg0, %c0_i32, %c0_i32_0, %c0_i32_1 : i32, i32, i32, i32
  }
  func.func @transform_4(%arg0: i32, %arg1: i32) -> (i32, i32, i32, i32) {
    %c0_i32 = arith.constant 0 : i32
    %c0_i32_0 = arith.constant 0 : i32
    %c0_i32_1 = arith.constant 0 : i32
    %c0_i32_2 = arith.constant 0 : i32
    return %arg0, %c0_i32, %c0_i32_0, %c0_i32_1 : i32, i32, i32, i32
  }
  func.func @transform_5(%arg0: i32, %arg1: i32) -> (i32, i32, i32, i32) {
    %c0_i32 = arith.constant 0 : i32
    %c0_i32_0 = arith.constant 0 : i32
    %c0_i32_1 = arith.constant 0 : i32
    %c0_i32_2 = arith.constant 0 : i32
    return %arg0, %c0_i32, %c0_i32_0, %c0_i32_1 : i32, i32, i32, i32
  }
}

</mosaic_0001>

<bundles_post_ra>
// kernel: tpu_custom_call.1
= control target key start
LH: loop header
LB: loop body
LE: loop exit
PB: predicated region body
PF: predicated region fallthrough
CT: control target
= control target key end

     0   :  { %s1617_s0 = inlined_call_operand.hbm [shape: f32[2,4,1,8,128], index: 0, kind: input, shape index: {}]   ;;  %s1618_s1 = inlined_call_operand.hbm [shape: f32[2,4,1,8,128], index: 1, kind: input, shape index: {}]   ;;  %s1619_s2 = inlined_call_operand.hbm [shape: f32[2,4,8,128], index: 2, kind: output, shape index: {0}]   ;;  %s1620_s3 = inlined_call_operand.hbm [shape: f32[2,4,8,128], index: 3, kind: output, shape index: {1}]   ;;  %s1621_s4 = inlined_call_operand.hbm [shape: f32[2,4,8,128], index: 4, kind: output, shape index: {2}]   ;;  %s1622_s5 = inlined_call_operand.hbm [shape: f32[2,4,8,128], index: 5, kind: output, shape index: {3}]  }
   0x1   :  { %1633 = sst [smem:[#allocation19_spill]] %s1617_s0 }
   0x2   :  { %11 = vsyncpa [#allocation3], 0 }
   0x3   :  { %13 = vsyncpa [#allocation3 + $0x1], 0 }
   0x4   :  { %14 = vsyncpa [#allocation6], 0 }
   0x5   :  { %16 = vsyncpa [#allocation6 + $0x1], 0 }
   0x6   :  { %17 = vsyncpa [#allocation4], 0 }
   0x7   :  { %19 = vsyncpa [#allocation4 + $0x1], 0 }
   0x8   :  { %20 = vsyncpa [#allocation9], 0 }
   0x9   :  { %22 = vsyncpa [#allocation9 + $0x1], 0 }
   0xa   :  { %23 = vsyncpa [#allocation12], 0 }
   0xb   :  { %25 = vsyncpa [#allocation12 + $0x1], 0  ;;  %s1195_s18 = smov 0   ;;  %s1197_s19 = smov 0  }
   0xc   :  { %s1199_s20 = smov 0   ;;  %s1201_s21 = smov 0  }
   0xd   :  { %s1203_s22 = smov 0   ;;  %s1205_s23 = smov 0  }
   0xe LB: > { %s1226_s24 = sadd.s32 4294967295, %s1153_s23   ;;  %s1623_s25 = sadd.s32 4294967294, %s1153_s23   ;;  %s1153_s23 = sphi %s1205_s23, %s31_s23   ;;  %s1149_s22 = sphi %s1203_s22, %s1657_s22   ;;  %s1145_s21 = sphi %s1201_s21, %s1656_s21   ;;  %s1141_s20 = sphi %s1199_s20, %s1655_s20   ;;  %s1137_s19 = sphi %s1197_s19, %s1654_s19   ;;  %s1133_s18 = sphi %s1195_s18, %s1653_s18  }
   0xf   : > { %s43_s26 = sadd.s32 1, %s1149_s22  ;;  %s52_s27 = sadd.s32 1, %s1141_s20 }
  0x10   : > { %p45_p0 = scmp.ge.s32.totalorder %s43_s26, 2  ;;  %p59_p1 = scmp.ne.s32.totalorder %s1141_s20, %s1137_s19 }
  0x11   : > { %p60_p2 = scmp.eq.s32.totalorder %s1153_s23, 0  ;;  %p65_p3 = scmp.ne.s32.totalorder %s1137_s19, %s1133_s18 }
  0x12   : > { %s1659_s26 = smov (%p45_p0, %s43_s26), 0  ;;  %p66_p5 = scmp.eq.s32.totalorder %s1226_s24, 0 }
  0x13   : > { %1634 = sst [smem:[#allocation18_spill]] %s1659_s26  ;;  %p1238_p4 = por %p60_p2, %p59_p1 }
  0x14   : > { %s47_s29 = ssub.s32 %s1149_s22, %s1659_s26  ;;  %p117_p6 = scmp.eq.s32.totalorder %s1226_s24, 1 }
  0x15   : > { %p50_p7 = scmp.eq.s32.totalorder %s47_s29, 0  ;;  %p1246_p8 = por %p66_p5, %p65_p3 }
  0x16   : > { %p1250_p9 = por %p117_p6, %p59_p1  ;;  %p123_p10 = scmp.eq.s32.totalorder %s1623_s25, 1 }
  0x17   : > { %s1636_s30 = scalar_select %p1246_p8, 1, 0 }
  0x18   : > { %s1637_s6 = scalar_select %p1250_p9, 1, 0 }
  0x19   : > { %s1257_s7 = scalar_select %p50_p7, %s1141_s20, %s52_s27  }
  0x1a   : > { %p1259_p11 = por %p123_p10, %p65_p3  ;;  %p836_p13 = scmp.lt.s32.totalorder %s1153_s23, 2 }
  0x1b   : > { %s1266_s9 = sand.u32 1, %s1141_s20   ;;  %s798_s11 = sshll.u32 %s1149_s22, 9 }
  0x1c   : > { %s1638_s8 = scalar_select %p1259_p11, 1, 0 }
  0x1d   : > { %s1624_s10 = sshll.u32 %s1266_s9, 5  ;;  %s1639_s0 = sld [smem:[#allocation19_spill]] }
  0x1e   : > { %s225_s15 = scalar_lea.vmem [#allocation2], %s1624_s10  ;;  %p1283_p0 = pnand %p836_p13, %p1238_p4 }
  0x1f   : > { %s233_s16 = sshll.u32 %s225_s15, 4  ;;  %s222_s27 = scalar_lea.sflag [#allocation3], %s1266_s9  ;;  %s1279_s16 = int_to_ptr.vmem [resolvable:$true] %s233_s16 }
  0x20   : > { %p917_p3 = pneg %p1283_p0 }
  0x23   : > { %s1275_s14 = scalar_lea.hbm %s1639_s0, %s798_s11  ;;  %s920_s28 = scalar_lea.hbm %s1639_s0, 1024 }
  0x24   : > { %s915_s29 = scalar_lea.hbm %s1275_s14, 512  ;;  %p921_p4 = scmp.lt.u32.totalorder %s1275_s14, %s1639_s0 }
  0x25   : > { %p916_p2 = scmp.ne.s32.totalorder %s1275_s14, %s915_s29  ;;  %p922_p7 = scmp.lt.u32.totalorder %s920_s28, %s915_s29 }
  0x26   : > { %p924_p13 = scmp.lt.u32.totalorder %s915_s29, %s1275_s14 }
  0x27   : > { %p918_p5 = pnand %p917_p3, %p916_p2  ;;  %p923_p10 = por %p922_p7, %p921_p4 }
  0x29   : > { %p919_p6 = pneg %p918_p5  ;;  %p925_p12 = por %p924_p13, %p923_p10 }
  0x2b   : > { %p926_p1 = pnand %p925_p12, %p919_p6 }
  0x2d   : > { %929 = shalt.err (!%p926_p1)
}
  0x2e   : > { %s930_s10 = scalar_lea.vmem %s1279_s16, 512  ;;  %s1155_s12 = smov [#allocation2]  }
  0x2f   : > { %p931_p2 = scmp.ne.s32.totalorder %s1279_s16, %s930_s10  ;;  %s935_s13 = sshll.u32 %s1155_s12, 4  ;;  %s936_s13 = int_to_ptr.vmem [resolvable:$false] %s935_s13 }
  0x30   : > { %s937_s25 = scalar_lea.vmem %s936_s13, 1024  ;;  %p938_p9 = scmp.lt.s32.totalorder %s1279_s16, %s936_s13 }
  0x31   : > { %p933_p5 = pnand %p931_p2, %p917_p3  ;;  %p939_p4 = scmp.lt.s32.totalorder %s937_s25, %s930_s10 }
  0x33   : > { %p934_p11 = pneg %p933_p5  ;;  %p940_p7 = por %p939_p4, %p938_p9 }
  0x35   : > { %p941_p10 = pnand %p940_p7, %p934_p11 }
  0x37   : > { %944 = shalt.err (!%p941_p10)
}
  0x38   : > { %s1627_s29 = smov 128   ;;  %s1157_s28 = smov 8  }
  0x39   : > { %819 = dma.hbm_to_vmem [thread:$0]  (!%p1283_p0), %s1275_s14, 512, %s1279_s16, %s222_s27, %s1627_s29, %s1627_s29, %s1157_s28  }
  0x3a   : > { %p263_p9 = scmp.lt.s32.totalorder %s1153_s23, 3  ;;  %s1325_s12 = scalar_lea.hbm %s1618_s1, %s798_s11 }
  0x3b   : > { %p1641_p11 = scmp.ge.s32.totalorder %s1153_s23, 1  ;;  %s1643_s25 = sshll.u32 %s1266_s9, 5 }
  0x3c   : > { %s247_s0 = scalar_lea.vmem [#allocation5], %s1643_s25  ;;  %s244_s14 = scalar_lea.sflag [#allocation6], %s1266_s9 }
  0x3d   : > { %p1329_p12 = pnand %p1641_p11, %p263_p9  ;;  %s255_s26 = sshll.u32 %s247_s0, 4  ;;  %s1335_s26 = int_to_ptr.vmem [resolvable:$true] %s255_s26 }
  0x3e   : > { %s945_s16 = scalar_lea.hbm %s1325_s12, 512  ;;  %s950_s10 = scalar_lea.hbm %s1618_s1, 1024 }
  0x3f   : > { %p946_p1 = scmp.ne.s32.totalorder %s1325_s12, %s945_s16  ;;  %p951_p2 = scmp.lt.u32.totalorder %s1325_s12, %s1618_s1 }
  0x40   : > { %p952_p5 = scmp.lt.u32.totalorder %s950_s10, %s945_s16  ;;  %p954_p7 = scmp.lt.u32.totalorder %s945_s16, %s1325_s12 }
  0x41   : > { %p948_p6 = pnand %p946_p1, %p917_p3 }
  0x42   : > { %p953_p4 = por %p952_p5, %p951_p2 }
  0x43   : > { %p949_p13 = pneg %p948_p6 }
  0x44   : > { %p955_p10 = por %p954_p7, %p953_p4 }
  0x46   : > { %p956_p9 = pnand %p955_p10, %p949_p13 }
  0x48   : > { %959 = shalt.err (!%p956_p9)
}
  0x49   : > { %s960_s0 = scalar_lea.vmem %s1335_s26, 512  ;;  %s1158_s25 = smov [#allocation5]  }
  0x4a   : > { %p961_p11 = scmp.ne.s32.totalorder %s1335_s26, %s960_s0  ;;  %s965_s11 = sshll.u32 %s1158_s25, 4  ;;  %s966_s11 = int_to_ptr.vmem [resolvable:$false] %s965_s11 }
  0x4b   : > { %s967_s29 = scalar_lea.vmem %s966_s11, 1024  ;;  %p968_p8 = scmp.lt.s32.totalorder %s1335_s26, %s966_s11 }
  0x4c   : > { %p963_p1 = pnand %p961_p11, %p917_p3  ;;  %p969_p2 = scmp.lt.s32.totalorder %s967_s29, %s960_s0 }
  0x4e   : > { %p964_p6 = pneg %p963_p1  ;;  %p970_p5 = por %p969_p2, %p968_p8 }
  0x50   : > { %p971_p4 = pnand %p970_p5, %p964_p6 }
  0x52   : > { %974 = shalt.err (!%p971_p4)
}
  0x53   : > { %s1644_s16 = smov 128   ;;  %267 = sbr.rel (%p1329_p12) target bundleno = 209 (0xd1), region = 28 }
  0x54   : > { %822 = dma.hbm_to_vmem [thread:$0]  (!%p1283_p0), %s1325_s12, 512, %s1335_s26, %s244_s14, %s1644_s16, %s1644_s16, %s1157_s28  }
  0x55   : > { %s1369_s27 = sand.u32 (!%p1329_p12), 1, %s1137_s19   ;;  %p1645_p8 = scmp.ne.s32.totalorder (!%p1329_p12), %s1636_s30, 0 }
  0x56   : > { %s1372_s10 = sshll.u32 (!%p1329_p12), %s1369_s27, 5  ;;  %s270_s17 = scalar_lea.sflag (!%p1329_p12), [#allocation3], %s1369_s27 }
  0x57   : > { %s273_s15 = scalar_lea.vmem (!%p1329_p12), [#allocation2], %s1372_s10 }
  0x5a   : > { %1112 = dma.done.wait (%p1645_p8), %s270_s17, 512  }
  0x5b   : > { %1114 = vsyncadd (%p1645_p8), %s270_s17, 4294966784  ;;  %s279_s26 = scalar_lea.sflag [#allocation6], %s1369_s27  ;;  %s282_s9 = scalar_lea.vmem [#allocation5], %s1372_s10 }
  0x5c   : > { %1116 = dma.done.wait (%p1645_p8), %s279_s26, 512  }
  0x5d   : > { %1118 = vsyncadd (%p1645_p8), %s279_s26, 4294966784  ;;  %v1386_v0 = vld [vmem:[%s273_s15] sm:$0xff]  ;;  %v1388_v1 = vld [vmem:[%s273_s15 + $0x8] sm:$0xff]  ;;  %s1399_s30 = sshll.u32 %s1145_s21, 9  ;;  %s328_s28 = scalar_lea.vmem [#allocation11], %s1372_s10 }
  0x5e   : > { %v357_v2 = vand.u32 2147483647, %v1386_v0  ;;  %v358_v3 = vand.u32 2147483647, %v1388_v1  ;;  %v1392_v4 = vld [vmem:[%s273_s15 + $0x10] sm:$0xff]  ;;  %v1394_v5 = vld [vmem:[%s273_s15 + $0x18] sm:$0xff]  ;;  %s1414_s14 = scalar_lea.hbm %s1622_s5, %s1399_s30 }
  0x5f   : > { %v359_v8 = vand.u32 2147483647, %v1392_v4  ;;  %v360_v9 = vand.u32 2147483647, %v1394_v5  ;;  %v1401_v13 = vld [vmem:[%s282_s9] sm:$0xff]  ;;  %v1403_v14 = vld [vmem:[%s282_s9 + $0x8] sm:$0xff] }
  0x60   : > { %v361_v6 = vsub.f32 0.0, %v357_v2  ;;  %v362_v7 = vsub.f32 0.0, %v358_v3  ;;  %s566_s12 = sshll.u32 %s328_s28, 4  ;;  %v1406_v17 = vld [vmem:[%s282_s9 + $0x10] sm:$0xff]  ;;  %v1408_v18 = vld [vmem:[%s282_s9 + $0x18] sm:$0xff]  ;;  %485 = vst [vmem:[%s328_s28] sm:$0xff] %v1401_v13  ;;  %486 = vst [vmem:[%s328_s28 + $0x8] sm:$0xff] %v1403_v14  ;;  %s1418_s12 = int_to_ptr.vmem [resolvable:$true] %s566_s12 }
  0x61   : > { %v363_v12 = vsub.f32 0.0, %v359_v8  ;;  %v364_v15 = vsub.f32 0.0, %v360_v9  ;;  %487 = vst [vmem:[%s328_s28 + $0x10] sm:$0xff] %v1406_v17  ;;  %488 = vst [vmem:[%s328_s28 + $0x18] sm:$0xff] %v1408_v18  ;;  %s505_s0 = scalar_lea.sflag [#allocation12], %s1369_s27  ;;  %s975_s25 = scalar_lea.vmem %s1418_s12, 512 }
  0x62   : > { %v365_v10 = vmul.f32 1.442695, %v361_v6  ;;  %v367_v11 = vmul.f32 1.442695, %v362_v7  ;;  %p976_p0 = scmp.ne.s32.totalorder %s1418_s12, %s975_s25  ;;  %p1646_p3 = scmp.ne.s32.totalorder %s1637_s6, 0 }
  0x63   : > { %v369_v16 = vmul.f32 1.442695, %v363_v12  ;;  %v371_v19 = vmul.f32 1.442695, %v364_v15  ;;  %s1159_s11 = smov [#allocation11]  }
  0x64   : > { %891 = vpow2.f32 %v365_v10  ;;  %p977_p12 = pnand %p976_p0, %p1646_p3  ;;  %s979_s29 = sshll.u32 %s1159_s11, 4  ;;  %s980_s29 = int_to_ptr.vmem [resolvable:$false] %s979_s29 }
  0x65   : > { %893 = vpow2.f32 %v367_v11  ;;  %s981_s16 = scalar_lea.vmem %s980_s29, 1024  ;;  %p982_p7 = scmp.lt.s32.totalorder %s1418_s12, %s980_s29 }
  0x66   : > { %895 = vpow2.f32 %v369_v16  ;;  %p978_p13 = pneg %p977_p12  ;;  %p983_p10 = scmp.lt.s32.totalorder %s981_s16, %s975_s25 }
  0x67   : > { %897 = vpow2.f32 %v371_v19 }
  0x68   : > { %p984_p9 = por %p983_p10, %p982_p7 }
  0x6a   : > { %p985_p11 = pnand %p984_p9, %p978_p13 }
  0x6c   : > { %988 = shalt.err (!%p985_p11)
}
  0x6d   : > { %s989_s17 = scalar_lea.hbm %s1414_s14, 512  ;;  %s993_s9 = scalar_lea.hbm %s1622_s5, 1024 }
  0x6e   : > { %p990_p1 = scmp.ne.s32.totalorder %s1414_s14, %s989_s17  ;;  %p994_p5 = scmp.lt.u32.totalorder %s1414_s14, %s1622_s5 }
  0x6f   : > { %p995_p4 = scmp.lt.u32.totalorder %s993_s9, %s989_s17  ;;  %p997_p0 = scmp.lt.u32.totalorder %s989_s17, %s1414_s14 }
  0x70   : > { %p991_p6 = pnand %p990_p1, %p1646_p3 }
  0x71   : > { %p996_p8 = por %p995_p4, %p994_p5 }
  0x72   : > { %p992_p2 = pneg %p991_p6 }
  0x73   : > { %p998_p12 = por %p997_p0, %p996_p8 }
  0x75   : > { %p999_p13 = pnand %p998_p12, %p992_p2 }
  0x77   : > { %1002 = shalt.err (!%p999_p13)
}
  0x78   : > { %s1629_s13 = smov 128   ;;  %s1631_s25 = smov 8   ;;  %v892_v20 = vpop.eup %891  ;;  %v405_v28 = vmax.f32 %v1386_v0, 0.0  ;;  %v409_v29 = vmul.f32 %v1401_v13, %v1386_v0  ;;  %v406_v30 = vmax.f32 %v1388_v1, 0.0  ;;  %v410_v31 = vmul.f32 %v1403_v14, %v1388_v1 }
  0x79   : > { %811 = dma.vmem_to_hbm [thread:$0]  (%p1646_p3), %s1418_s12, 512, %s1414_s14, %s505_s0, %s1629_s13, %s1629_s13, %s1631_s25   ;;  %v894_v21 = vpop.eup %893  ;;  %v373_v22 = vadd.f32 1.0, %v892_v20  ;;  %v407_v32 = vmax.f32 %v1392_v4, 0.0  ;;  %v411_v33 = vmul.f32 %v1406_v17, %v1392_v4  ;;  %v408_v34 = vmax.f32 %v1394_v5, 0.0 }
  0x7a   : > { %v896_v23 = vpop.eup %895  ;;  %v374_v24 = vadd.f32 1.0, %v894_v21  ;;  %v412_v35 = vmul.f32 %v1408_v18, %v1394_v5  ;;  %vm393_vm0 = vcmp.ge.f32.partialorder %v1386_v0, 0.0  ;;  %vm394_vm1 = vcmp.ge.f32.partialorder %v1388_v1, 0.0  ;;  %s494_s12 = sand.u32 1, %s1226_s24   ;;  %s321_s14 = scalar_lea.vmem [#allocation10], %s1372_s10 }
  0x7b   : > { %v898_v25 = vpop.eup %897  ;;  %899 = vrcp.f32 %v373_v22  ;;  %v375_v26 = vadd.f32 1.0, %v896_v23  ;;  %vm395_vm2 = vcmp.ge.f32.partialorder %v1392_v4, 0.0  ;;  %vm396_vm3 = vcmp.ge.f32.partialorder %v1394_v5, 0.0  ;;  %s314_s0 = scalar_lea.vmem [#allocation8], %s1372_s10  ;;  %s550_s29 = sshll.u32 %s321_s14, 4  ;;  %s1496_s29 = int_to_ptr.vmem [resolvable:$true] %s550_s29 }
  0x7c   : > { %901 = vrcp.f32 %v374_v24  ;;  %v376_v27 = vadd.f32 1.0, %v898_v25  ;;  %v413_v41 = vsub.f32 %v405_v28, %v409_v29  ;;  %v414_v42 = vsub.f32 %v406_v30, %v410_v31  ;;  %s534_s11 = sshll.u32 %s314_s0, 4  ;;  %s1480_s15 = scalar_lea.hbm %s1620_s3, %s1399_s30  ;;  %s1486_s11 = int_to_ptr.vmem [resolvable:$true] %s534_s11 }
  0x7d   : > { %903 = vrcp.f32 %v375_v26  ;;  %v415_v46 = vsub.f32 %v407_v32, %v411_v33  ;;  %v416_v47 = vsub.f32 %v408_v34, %v412_v35  ;;  %s1483_s26 = scalar_lea.vmem [#allocation7], %s1372_s10  ;;  %s1494_s10 = scalar_lea.hbm %s1621_s4, %s1399_s30 }
  0x7e   : > { %905 = vrcp.f32 %v376_v27  ;;  %s518_s9 = sshll.u32 %s1483_s26, 4  ;;  %s1503_s13 = scalar_lea.hbm %s1619_s2, %s1399_s30  ;;  %s1505_s9 = int_to_ptr.vmem [resolvable:$true] %s518_s9 }
  0x7f   : > { %907 = vlog2.f32 %v373_v22  ;;  %s1510_s25 = scalar_lea.sflag [#allocation9], %s494_s12  ;;  %s1003_s28 = scalar_lea.vmem %s1486_s11, 512 }
  0x80   : > { %909 = vlog2.f32 %v374_v24  ;;  %p1004_p7 = scmp.ne.s32.totalorder %s1486_s11, %s1003_s28  ;;  %s1162_s21 = smov [#allocation8]  }
  0x81   : > { %911 = vlog2.f32 %v375_v26 }
  0x82   : > { %913 = vlog2.f32 %v376_v27  ;;  %p1005_p10 = pnand %p1004_p7, %p1646_p3 }
  0x84   : > { %p1006_p9 = pneg %p1005_p10 }
  0x85   : > { %v900_v36 = vpop.eup %899 }
  0x86   : > { %v902_v37 = vpop.eup %901  ;;  %v397_v38 = vsub.f32 1.0, %v900_v36 }
  0x87   : > { %v904_v39 = vpop.eup %903  ;;  %v398_v40 = vsub.f32 1.0, %v902_v37 }
  0x88   : > { %v906_v43 = vpop.eup %905  ;;  %v401_v44 = vsel %vm393_vm0, %v900_v36, %v397_v38  ;;  %v399_v45 = vsub.f32 1.0, %v904_v39 }
  0x89   : > { %v908_v48 = vpop.eup %907  ;;  %v421_v49 = vmul.f32 %v401_v44, %v1401_v13  ;;  %v402_v50 = vsel %vm394_vm1, %v902_v37, %v398_v40  ;;  %v400_v51 = vsub.f32 1.0, %v906_v43  ;;  %469 = vst [vmem:[%s321_s14] sm:$0xff] %v401_v44 }
  0x8a   : > { %v910_v52 = vpop.eup %909  ;;  %v422_v53 = vmul.f32 %v402_v50, %v1403_v14  ;;  %v403_v54 = vsel %vm395_vm2, %v904_v39, %v399_v45  ;;  %v378_v55 = vmul.f32 0.6931472, %v908_v48  ;;  %470 = vst [vmem:[%s321_s14 + $0x8] sm:$0xff] %v402_v50 }
  0x8b   : > { %v912_v56 = vpop.eup %911  ;;  %v423_v57 = vmul.f32 %v403_v54, %v1406_v17  ;;  %v404_v58 = vsel %vm396_vm3, %v906_v43, %v400_v51  ;;  %v380_v59 = vmul.f32 0.6931472, %v910_v52  ;;  %453 = vst [vmem:[%s314_s0] sm:$0xff] %v421_v49  ;;  %471 = vst [vmem:[%s321_s14 + $0x10] sm:$0xff] %v403_v54 }
  0x8c   : > { %v914_v60 = vpop.eup %913  ;;  %v424_v61 = vmul.f32 %v404_v58, %v1408_v18  ;;  %v417_v62 = vadd.f32 %v413_v41, %v378_v55  ;;  %v382_v63 = vmul.f32 0.6931472, %v912_v56  ;;  %454 = vst [vmem:[%s314_s0 + $0x8] sm:$0xff] %v422_v53  ;;  %472 = vst [vmem:[%s321_s14 + $0x18] sm:$0xff] %v404_v58 }
  0x8d   : > { %v418_v0 = vadd.f32 %v414_v42, %v380_v59  ;;  %v384_v1 = vmul.f32 0.6931472, %v914_v60  ;;  %455 = vst [vmem:[%s314_s0 + $0x10] sm:$0xff] %v423_v57 }
  0x8e   : > { %v419_v2 = vadd.f32 %v415_v46, %v382_v63  ;;  %456 = vst [vmem:[%s314_s0 + $0x18] sm:$0xff] %v424_v61  ;;  %437 = vst [vmem:[%s1483_s26] sm:$0xff] %v417_v62  ;;  %s1007_s0 = sshll.u32 %s1162_s21, 4  ;;  %s1008_s0 = int_to_ptr.vmem [resolvable:$false] %s1007_s0 }
  0x8f   : > { %v1488_v3 = vadd.f32 %v416_v47, %v384_v1  ;;  %438 = vst [vmem:[%s1483_s26 + $0x8] sm:$0xff] %v418_v0  ;;  %s1009_s14 = scalar_lea.vmem %s1008_s0, 1024  ;;  %p1010_p11 = scmp.lt.s32.totalorder %s1486_s11, %s1008_s0 }
  0x90   : > { %p1011_p1 = scmp.lt.s32.totalorder %s1009_s14, %s1003_s28 }
  0x92   : > { %p1012_p6 = por %p1011_p1, %p1010_p11 }
  0x94   : > { %p1013_p2 = pnand %p1012_p6, %p1006_p9 }
  0x96   : > { %1016 = shalt.err (!%p1013_p2)
}
  0x97   : > { %s1017_s24 = scalar_lea.hbm %s1480_s15, 512  ;;  %s1021_s16 = scalar_lea.hbm %s1620_s3, 1024 }
  0x98   : > { %p1018_p5 = scmp.ne.s32.totalorder %s1480_s15, %s1017_s24  ;;  %p1022_p0 = scmp.lt.u32.totalorder %s1480_s15, %s1620_s3 }
  0x99   : > { %p1023_p12 = scmp.lt.u32.totalorder %s1021_s16, %s1017_s24  ;;  %p1025_p7 = scmp.lt.u32.totalorder %s1017_s24, %s1480_s15 }
  0x9a   : > { %p1019_p4 = pnand %p1018_p5, %p1646_p3 }
  0x9b   : > { %p1024_p13 = por %p1023_p12, %p1022_p0 }
  0x9c   : > { %p1020_p8 = pneg %p1019_p4 }
  0x9d   : > { %p1026_p10 = por %p1025_p7, %p1024_p13 }
  0x9f   : > { %p1027_p9 = pnand %p1026_p10, %p1020_p8 }
  0xa1   : > { %1030 = shalt.err (!%p1027_p9)
}
  0xa2   : > { %s1647_s28 = smov 8   ;;  %s1648_s0 = smov 128   ;;  %439 = vst [vmem:[%s1483_s26 + $0x10] sm:$0xff] %v419_v2 }
  0xa3   : > { %809 = dma.vmem_to_hbm [thread:$0]  (%p1646_p3), %s1486_s11, 512, %s1480_s15, %s1510_s25, %s1648_s0, %s1648_s0, %s1647_s28  }
  0xa4   : > { %s1031_s14 = scalar_lea.vmem %s1496_s29, 512  ;;  %s1163_s24 = smov [#allocation10]  }
  0xa5   : > { %p1032_p11 = scmp.ne.s32.totalorder %s1496_s29, %s1031_s14  ;;  %s1035_s30 = sshll.u32 %s1163_s24, 4  ;;  %s1036_s30 = int_to_ptr.vmem [resolvable:$false] %s1035_s30 }
  0xa6   : > { %s1037_s12 = scalar_lea.vmem %s1036_s30, 1024  ;;  %p1038_p2 = scmp.lt.s32.totalorder %s1496_s29, %s1036_s30 }
  0xa7   : > { %p1033_p1 = pnand %p1032_p11, %p1646_p3  ;;  %p1039_p5 = scmp.lt.s32.totalorder %s1037_s12, %s1031_s14 }
  0xa9   : > { %p1034_p6 = pneg %p1033_p1  ;;  %p1040_p4 = por %p1039_p5, %p1038_p2 }
  0xab   : > { %p1041_p8 = pnand %p1040_p4, %p1034_p6 }
  0xad   : > { %1044 = shalt.err (!%p1041_p8)
}
  0xae   : > { %s1045_s11 = scalar_lea.hbm %s1494_s10, 512  ;;  %s1049_s17 = scalar_lea.hbm %s1621_s4, 1024 }
  0xaf   : > { %p1046_p0 = scmp.ne.s32.totalorder %s1494_s10, %s1045_s11  ;;  %p1050_p7 = scmp.lt.u32.totalorder %s1494_s10, %s1621_s4 }
  0xb0   : > { %p1051_p10 = scmp.lt.u32.totalorder %s1049_s17, %s1045_s11  ;;  %p1053_p11 = scmp.lt.u32.totalorder %s1045_s11, %s1494_s10 }
  0xb1   : > { %p1047_p12 = pnand %p1046_p0, %p1646_p3 }
  0xb2   : > { %p1052_p9 = por %p1051_p10, %p1050_p7 }
  0xb3   : > { %p1048_p13 = pneg %p1047_p12 }
  0xb4   : > { %p1054_p1 = por %p1053_p11, %p1052_p9 }
  0xb6   : > { %p1055_p6 = pnand %p1054_p1, %p1048_p13 }
  0xb8   : > { %1058 = shalt.err (!%p1055_p6)
}
  0xb9   : > { %810 = dma.vmem_to_hbm [thread:$0]  (%p1646_p3), %s1496_s29, 512, %s1494_s10, %s1510_s25, %s1648_s0, %s1648_s0, %s1647_s28  }
  0xba   : > { %440 = vst [vmem:[%s1483_s26 + $0x18] sm:$0xff] %v1488_v3  ;;  %s490_s14 = scalar_lea.sflag [#allocation4], %s1369_s27  ;;  %s1059_s30 = scalar_lea.vmem %s1505_s9, 512 }
  0xbb   : > { %p1060_p2 = scmp.ne.s32.totalorder %s1505_s9, %s1059_s30  ;;  %s1164_s12 = smov [#allocation7]  }
  0xbc   : > { %s1063_s11 = sshll.u32 %s1164_s12, 4  ;;  %s1064_s11 = int_to_ptr.vmem [resolvable:$false] %s1063_s11 }
  0xbd   : > { %p1061_p5 = pnand %p1060_p2, %p1646_p3  ;;  %s1065_s15 = scalar_lea.vmem %s1064_s11, 1024 }
  0xbe   : > { %p1066_p8 = scmp.lt.s32.totalorder %s1505_s9, %s1064_s11  ;;  %p1067_p0 = scmp.lt.s32.totalorder %s1065_s15, %s1059_s30 }
  0xbf   : > { %p1062_p4 = pneg %p1061_p5 }
  0xc0   : > { %p1068_p12 = por %p1067_p0, %p1066_p8 }
  0xc2   : > { %p1069_p13 = pnand %p1068_p12, %p1062_p4 }
  0xc4   : > { %1072 = shalt.err (!%p1069_p13)
}
  0xc5   : > { %s1073_s25 = scalar_lea.hbm %s1503_s13, 512  ;;  %s1077_s10 = scalar_lea.hbm %s1619_s2, 1024 }
  0xc6   : > { %p1074_p7 = scmp.ne.s32.totalorder %s1503_s13, %s1073_s25  ;;  %p1078_p11 = scmp.lt.u32.totalorder %s1503_s13, %s1619_s2 }
  0xc7   : > { %p1079_p1 = scmp.lt.u32.totalorder %s1077_s10, %s1073_s25  ;;  %p1081_p2 = scmp.lt.u32.totalorder %s1073_s25, %s1503_s13 }
  0xc8   : > { %p1075_p10 = pnand %p1074_p7, %p1646_p3 }
  0xc9   : > { %p1080_p6 = por %p1079_p1, %p1078_p11 }
  0xca   : > { %p1076_p9 = pneg %p1075_p10 }
  0xcb   : > { %p1082_p5 = por %p1081_p2, %p1080_p6 }
  0xcd   : > { %p1083_p4 = pnand %p1082_p5, %p1076_p9 }
  0xcf   : > { %1086 = shalt.err (!%p1083_p4)
}
  0xd0   : > { %808 = dma.vmem_to_hbm [thread:$0]  (%p1646_p3), %s1505_s9, 512, %s1503_s13, %s490_s14, %s1648_s0, %s1648_s0, %s1647_s28  }
  0xd1 PF: > { %s581_s21 = sand.u32 1, %s1133_s18   ;;  %p1649_p8 = scmp.ne.s32.totalorder %s1638_s8, 0 }
  0xd2   : > { %p1650_p0 = scmp.ge.s32.totalorder %s1153_s23, 2  ;;  %s582_s24 = scalar_lea.sflag [#allocation4], %s581_s21 }
  0xd4   : > { %p824_p12 = pnand %p1650_p0, %p1649_p8 }
  0xd6   : > { %1120 = dma.done.wait (!%p824_p12), %s582_s24, 512  }
  0xd7   : > { %1122 = vsyncadd (!%p824_p12), %s582_s24, 4294966784  ;;  %s1651_s6 = sadd.s32 4294967294, %s1153_s23  }
  0xd8   : > { %s590_s30 = sand.u32 1, %s1651_s6  }
  0xd9   : > { %s591_s12 = scalar_lea.sflag [#allocation9], %s590_s30 }
  0xda   : > { %1124 = dma.done.wait (!%p824_p12), %s591_s12, 1024  }
  0xdb   : > { %1126 = vsyncadd (!%p824_p12), %s591_s12, 4294966272  ;;  %s609_s27 = scalar_lea.sflag [#allocation12], %s581_s21 }
  0xdc   : > { %1128 = dma.done.wait (!%p824_p12), %s609_s27, 512  }
  0xdd   : > { %1130 = vsyncadd (!%p824_p12), %s609_s27, 4294966784  ;;  %s31_s23 = sadd.s32 1, %s1153_s23   ;;  %s1652_s8 = sld [smem:[#allocation18_spill]] }
  0xde   : > { %p28_p3 = scmp.ge.s32.totalorder %s31_s23, 4   ;;  %s1653_s18 = smov %s1137_s19 }
  0xdf   : > { %s1654_s19 = smov %s1141_s20  ;;  %s1655_s20 = smov %s1257_s7 }
  0xe0   : > { %s1656_s21 = smov %s1149_s22  ;;  %30 = sbr.rel (!%p28_p3) target bundleno = 14 (0xe), region = 139 }
  0xe3   : > { %s1657_s22 = smov %s1652_s8 }
  0xe7   :  { %614 = vsyncpa [#allocation3], 1 }
  0xe8   :  { %616 = vsyncpa [#allocation3 + $0x1], 1 }
  0xe9   :  { %617 = vsyncpa [#allocation6], 1 }
  0xea   :  { %619 = vsyncpa [#allocation6 + $0x1], 1 }
  0xeb   :  { %620 = vsyncpa [#allocation4], 1 }
  0xec   :  { %622 = vsyncpa [#allocation4 + $0x1], 1 }
  0xed   :  { %623 = vsyncpa [#allocation9], 1 }
  0xee   :  { %625 = vsyncpa [#allocation9 + $0x1], 1 }
  0xef   :  { %626 = vsyncpa [#allocation12], 1 }
  0xf0   :  { %628 = vsyncpa [#allocation12 + $0x1], 1 }

</bundles_post_ra>
